<compile_context>
chip_gen: v7x
topology: tpu7x:2x2x1
jax: 0.10.0
libtpu: 0.0.40
codegen_flags: <defaults>
</compile_context>

<pallas_src>
import jax
import jax.numpy as jnp
from jax.experimental import pallas as pl
from jax.experimental.pallas import tpu as pltpu

_LANES = 128


def _sigmu_kernel(u_ref, o_ref):
    # y = 2/(1+exp(-u)) - 1 == tanh(u/2). Compute in f32 (EUP tanh + VALU mul);
    # upcast also covers bf16 inputs on v5e (no bf16 VPU/EUP there).
    u = u_ref[...].astype(jnp.float32)
    o_ref[...] = jnp.tanh(0.5 * u).astype(o_ref.dtype)


def sigmu(u: jax.Array, *, row_tile: int = 4096) -> jax.Array:
    """Elementwise y = 2/(1+exp(-u)) - 1, computed in a Pallas TPU kernel.

    Keeps the input dtype end-to-end (bf16 in -> bf16 out), halving HBM traffic
    for bf16 models.
    """
    orig_shape = u.shape
    orig_dtype = u.dtype
    total = u.size

    flat = u.reshape(-1)

    # Pad only to a lane multiple (128). Common NN case: total % 128 == 0 -> no-op,
    # no extra HBM read/write passes outside the kernel.
    rem = total % _LANES
    padded_total = total if rem == 0 else total + (_LANES - rem)
    if padded_total != total:
        flat = jnp.pad(flat, (0, padded_total - total))
    rows = padded_total // _LANES
    u2d = flat.reshape(rows, _LANES)

    # Block sizing: ~2 MiB per block (f32) at row_tile=4096; clamp for small
    # inputs while keeping the sublane dim a multiple of 8.
    rows_rounded = ((rows + 7) // 8) * 8
    tile = min(row_tile, rows_rounded)
    tile = max(8, (tile // 8) * 8)

    grid = (pl.cdiv(rows, tile),)

    out2d = pl.pallas_call(
        _sigmu_kernel,
        out_shape=jax.ShapeDtypeStruct((rows, _LANES), orig_dtype),
        grid_spec=pltpu.PrefetchScalarGridSpec(
            num_scalar_prefetch=0,
            grid=grid,
            in_specs=[pl.BlockSpec((tile, _LANES), lambda i: (i, 0))],
            out_specs=pl.BlockSpec((tile, _LANES), lambda i: (i, 0)),
        ),
        compiler_params=pltpu.CompilerParams(
            # Keep the single grid axis "parallel" so v7x's two TensorCores
            # each stream half of the tensor (megacore sharding).
            dimension_semantics=("parallel",),
        ),
    )(u2d)

    if padded_total != total:
        out = out2d.reshape(-1)[:total].reshape(orig_shape)
    else:
        out = out2d.reshape(orig_shape)
    return out


if __name__ == "__main__":
    key = jax.random.PRNGKey(0)

    # Small NCHW input consistent with the module's (elementwise) usage.
    x = jax.random.normal(key, (2, 4, 16, 16), dtype=jnp.float32)
    y = jax.block_until_ready(sigmu(x))
    y_ref = 2.0 / (1.0 + jnp.exp(-x)) - 1.0
    assert y.shape == x.shape and y.dtype == x.dtype
    assert jnp.max(jnp.abs(y - y_ref)) < 1e-5

    # Exercise the ragged / non-128-multiple path too.
    key2 = jax.random.split(key)[0]
    x2 = jax.random.normal(key2, (3, 5, 7, 11), dtype=jnp.float32)
    y2 = jax.block_until_ready(sigmu(x2))
    y2_ref = 2.0 / (1.0 + jnp.exp(-x2)) - 1.0
    assert y2.shape == x2.shape and y2.dtype == x2.dtype
    assert jnp.max(jnp.abs(y2 - y2_ref)) < 1e-5

    print("KERNEL_OK")
</pallas_src>

<mosaic_0001>
module attributes {stable_mosaic.version = 11 : i64} {
  func.func @_sigmu_kernel(%arg0: i32, %arg1: memref<16x128xf32, #tpu.memory_space<vmem>>, %arg2: memref<16x128xf32, #tpu.memory_space<vmem>>) attributes {dimension_semantics = [#tpu.dimension_semantics<parallel>], iteration_bounds = array<i64: 1>, scalar_prefetch = 0 : i64, scratch_operands = 0 : i64, tpu.core_type = #tpu.core_type<tc>, window_params = [{transform_indices = @transform_0, window_bounds = array<i64: 16, 128>}, {transform_indices = @transform_1, window_bounds = array<i64: 16, 128>}]} {
    %c0 = arith.constant 0 : index
    %c0_0 = arith.constant 0 : index
    %0 = vector.load %arg1[%c0, %c0_0] : memref<16x128xf32, #tpu.memory_space<vmem>>, vector<16x128xf32>
    %cst = arith.constant 5.000000e-01 : f32
    %1 = vector.broadcast %cst : f32 to vector<16x128xf32>
    %2 = arith.mulf %1, %0 : vector<16x128xf32>
    %3 = math.tanh %2 : vector<16x128xf32>
    %c0_1 = arith.constant 0 : index
    %c0_2 = arith.constant 0 : index
    %4 = vector.load %arg2[%c0_1, %c0_2] : memref<16x128xf32, #tpu.memory_space<vmem>>, vector<16x128xf32>
    tpu.vector_store %arg2[%c0_1, %c0_2], %3 {strides = array<i32>} : memref<16x128xf32, #tpu.memory_space<vmem>>, vector<16x128xf32>,
    return
  }
  func.func @transform_0(%arg0: i32) -> (i32, i32) {
    %c0_i32 = arith.constant 0 : i32
    %c0_i32_0 = arith.constant 0 : i32
    return %arg0, %c0_i32 : i32, i32
  }
  func.func @transform_1(%arg0: i32) -> (i32, i32) {
    %c0_i32 = arith.constant 0 : i32
    %c0_i32_0 = arith.constant 0 : i32
    return %arg0, %c0_i32 : i32, i32
  }
}

</mosaic_0001>

<bundles_post_ra>
// kernel: tpu_custom_call.1
= control target key start
LH: loop header
LB: loop body
LE: loop exit
PB: predicated region body
PF: predicated region fallthrough
CT: control target
= control target key end

     0   :  { %6 = vsyncpa [#allocation3], 0  ;;  %s148_s0 = inlined_call_operand.hbm [shape: f32[16,128], index: 0, kind: input, shape index: {}]   ;;  %s149_s1 = inlined_call_operand.hbm [shape: f32[16,128], index: 1, kind: output, shape index: {}]  }
   0x1   :  { %7 = vsyncpa [#allocation4], 0  ;;  %s104_s6 = smov [#allocation2]   ;;  %s56_s10 = scalar_lea.hbm %s148_s0, 256 }
   0x2   :  { %s13_s7 = sshll.u32 %s104_s6, 4  ;;  %p57_p0 = scmp.ne.s32.totalorder %s148_s0, %s56_s10  ;;  %s14_s7 = int_to_ptr.vmem [resolvable:$true] %s13_s7 }
   0x3   :  { %p60_p1 = scmp.lt.u32.totalorder %s56_s10, %s148_s0 }
   0x5   :  { %p62_p2 = pnand %p60_p1, %p57_p0 }
   0x7   :  { %65 = shalt.err (!%p62_p2)
}
   0x8   :  { %s66_s15 = scalar_lea.vmem %s14_s7, 256  ;;  %p71_p4 = scmp.lt.s32.totalorder %s14_s7, %s14_s7 }
   0x9   :  { %p67_p3 = scmp.ne.s32.totalorder %s14_s7, %s66_s15  ;;  %p72_p5 = scmp.lt.s32.totalorder %s66_s15, %s66_s15 }
   0xb   :  { %p73_p6 = por %p72_p5, %p71_p4 }
   0xd   :  { %p74_p7 = pnand %p73_p6, %p67_p3 }
   0xf   :  { %77 = shalt.err (!%p74_p7)
}
  0x10   :  { %s105_s16 = smov 128   ;;  %s106_s17 = smov 8  }
  0x11   :  { %19 = dma.hbm_to_vmem [thread:$0]  %s148_s0, 256, %s14_s7, [#allocation3], %s105_s16, %s105_s16, %s106_s17  }
  0x12   :  { %100 = dma.done.wait [#allocation3], 256  }
  0x13   :  { %101 = vsyncadd [#allocation3], 4294967040  ;;  %v23_v0 = vld [vmem:[#allocation2] sm:$0xff]  ;;  %v24_v1 = vld [vmem:[#allocation2 + $0x8] sm:$0xff]  ;;  %s107_s20 = smov [#allocation5]  }
  0x14   :  { %v25_v2 = vmul.f32 0.5, %v23_v0  ;;  %v26_v3 = vmul.f32 0.5, %v24_v1  ;;  %s36_s21 = sshll.u32 %s107_s20, 4  ;;  %s37_s21 = int_to_ptr.vmem [resolvable:$true] %s36_s21 }
  0x15   :  { %s78_s22 = scalar_lea.vmem %s37_s21, 256  ;;  %p83_p9 = scmp.lt.s32.totalorder %s37_s21, %s37_s21 }
  0x16   :  { %52 = vtanh.f32 %v25_v2  ;;  %p79_p8 = scmp.ne.s32.totalorder %s37_s21, %s78_s22  ;;  %p84_p10 = scmp.lt.s32.totalorder %s78_s22, %s78_s22 }
  0x17   :  { %54 = vtanh.f32 %v26_v3 }
  0x18   :  { %p85_p11 = por %p84_p10, %p83_p9 }
  0x1a   :  { %p86_p12 = pnand %p85_p11, %p79_p8 }
  0x20   :  { %v53_v4 = vpop.eup %52 }
  0x21   :  { %v55_v5 = vpop.eup %54  ;;  %29 = vst [vmem:[#allocation5] sm:$0xff] %v53_v4 }
  0x22   :  { %30 = vst [vmem:[#allocation5 + $0x8] sm:$0xff] %v55_v5 }
  0x23   :  { %89 = shalt.err (!%p86_p12)
}
  0x24   :  { %s90_s24 = scalar_lea.hbm %s149_s1, 256 }
  0x25   :  { %p91_p13 = scmp.ne.s32.totalorder %s149_s1, %s90_s24  ;;  %p94_p0 = scmp.lt.u32.totalorder %s90_s24, %s149_s1 }
  0x27   :  { %p96_p1 = pnand %p94_p0, %p91_p13 }
  0x29   :  { %99 = shalt.err (!%p96_p1)
}
  0x2a   :  { %42 = dma.vmem_to_hbm [thread:$0]  %s37_s21, 256, %s149_s1, [#allocation4], %s105_s16, %s105_s16, %s106_s17  }
  0x2b   :  { %102 = dma.done.wait [#allocation4], 256  }
  0x2c   :  { %103 = vsyncadd [#allocation4], 4294967040 }
  0x2d   :  { %46 = vsyncpa [#allocation3], 1 }
  0x2e   :  { %47 = vsyncpa [#allocation4], 1 }

</bundles_post_ra>
